<compile_context>
chip_gen: v7x
topology: tpu7x:2x2x1
jax: 0.10.0
libtpu: 0.0.40
codegen_flags: <defaults>
</compile_context>

<pallas_src>
import jax
import jax.numpy as jnp
from jax.experimental import pallas as pl
from jax.experimental.pallas import tpu as pltpu

_LANE = 128


def _neg_hardsigmoid_kernel(x_ref, o_ref):
    # relu6(3x + 3)/6 - 0.5  ==  clip(0.5*x, -0.5, 0.5)  (3 VPU ops instead of 6)
    o_ref[...] = jnp.clip(x_ref[...] * 0.5, -0.5, 0.5).astype(o_ref.dtype)


def _cdiv(a: int, b: int) -> int:
    return -(-a // b)


def _round_up(v: int, m: int) -> int:
    return _cdiv(v, m) * m


def _xla_neg_hardsigmoid(x: jax.Array) -> jax.Array:
    # Fused XLA fallback (tiny inputs / ragged large inputs): same math, same dtype.
    return jnp.clip(x * 0.5, -0.5, 0.5).astype(x.dtype)


def _chip_params():
    """(target_block_bytes, is_two_tensorcore_chip, vmem_limit_bytes), best effort."""
    vmem_bytes = 128 * 1024 * 1024
    try:
        info = pltpu.get_tpu_info()
        vmem_bytes = int(getattr(info, "vmem_capacity_bytes", vmem_bytes))
    except Exception:
        pass
    kind = ""
    try:
        kind = jax.devices()[0].device_kind.lower()
    except Exception:
        pass
    # v7x: 2 TensorCores/chip, 64 MiB VMEM/TC, ~3.2 TB/s HBM -> bigger blocks, even grids.
    is_v7x = ("v7" in kind) or (vmem_bytes <= 64 * 1024 * 1024)
    target_block_bytes = (4 if is_v7x else 2) * 1024 * 1024
    # in+out double-buffered = 4x block live; 16/32 MiB limit has ample headroom on all
    # of v5e (16 MiB scoped default raised explicitly), v6e (128 MiB), v7x (64 MiB).
    vmem_limit_bytes = min(vmem_bytes // 2, 32 * 1024 * 1024)
    return target_block_bytes, is_v7x, vmem_limit_bytes


def neg_hardsigmoid(
    x: jax.Array,
    *,
    xla_fastpath_bytes: int = 1 << 20,
    target_block_bytes: int | None = None,
    donate: bool = False,
) -> jax.Array:
    """Elementwise NegHardsigmoid: relu6(3x+3)/6 - 0.5. Accepts any shape (e.g. NCHW).

    Only floating dtypes are supported (matches the PyTorch module's semantics).
    """
    orig_shape = x.shape
    dtype = x.dtype
    if not jnp.issubdtype(dtype, jnp.floating):
        raise TypeError(f"neg_hardsigmoid only supports floating dtypes, got {dtype}")
    n = x.size
    if n == 0:
        return x

    itemsize = jnp.dtype(dtype).itemsize
    auto_block, is_v7x, vmem_limit_bytes = _chip_params()
    if target_block_bytes is None:
        target_block_bytes = auto_block

    # Fast path 1: tiny tensors -> fused XLA clip (launch overhead would dominate).
    if n * itemsize < xla_fastpath_bytes:
        return _xla_neg_hardsigmoid(x)

    # Fast path 2: large tensors whose element count is not a multiple of 128 would
    # need jnp.pad + output slice (2 extra full HBM passes). XLA's fused elementwise
    # clip is already at HBM roofline for this rare case, so use it instead.
    if n % _LANE != 0:
        return _xla_neg_hardsigmoid(x)

    # Sublane multiple per dtype packing (f32: 8, bf16/f16: 16, fp8/int8: 32).
    min_sub = {4: 8, 2: 16, 1: 32}.get(itemsize, 8)

    # Lane-dense width that divides n exactly -> no padding, unmasked lane-dense stores.
    lanes = _LANE
    for cand in (2048, 1024, 512, 256):
        if n % cand == 0:
            lanes = cand
            break
    rows = n // lanes
    x2d = x.reshape(rows, lanes)

    # Row tile: ~target_block_bytes per block, aligned to the sublane multiple.
    tr = max(min_sub, (target_block_bytes // (lanes * itemsize)) // min_sub * min_sub)
    if rows <= tr:
        if is_v7x and rows >= 2 * min_sub:
            # 2 grid steps so the "parallel" axis shards across both v7x TensorCores.
            tr = _round_up(_cdiv(rows, 2), min_sub)
        else:
            # Single full-extent block (always a legal block shape); no forced split
            # on single-TC v5e/v6e (an extra step is pure overhead there).
            tr = rows
    elif is_v7x:
        # Keep small grids even so the two TensorCores get balanced work.
        steps = _cdiv(rows, tr)
        if steps % 2 == 1 and steps <= 16:
            tr_even = _round_up(_cdiv(rows, steps + 1), min_sub)
            if tr_even >= min_sub and _cdiv(rows, tr_even) % 2 == 0:
                tr = tr_even

    grid = (_cdiv(rows, tr),)  # last block may be partial -> masked stores, still correct

    extra = {}
    if donate:
        # Same shape/dtype in and out: write in place. Only a win when the caller
        # donates x at the jit boundary; otherwise XLA inserts a protective copy.
        extra["input_output_aliases"] = {0: 0}

    out2d = pl.pallas_call(
        _neg_hardsigmoid_kernel,
        out_shape=jax.ShapeDtypeStruct((rows, lanes), dtype),
        grid=grid,
        in_specs=[pl.BlockSpec((tr, lanes), lambda i: (i, 0))],
        out_specs=pl.BlockSpec((tr, lanes), lambda i: (i, 0)),
        compiler_params=pltpu.CompilerParams(
            dimension_semantics=("parallel",),
            vmem_limit_bytes=vmem_limit_bytes,
        ),
        **extra,
    )(x2d)

    return out2d.reshape(orig_shape)


def neg_hardsigmoid_ref(x: jax.Array) -> jax.Array:
    # Exact transcription of the PyTorch module: relu6(3x + 3) / 6 - 0.5
    return jnp.clip(3.0 * x + 3.0, 0.0, 6.0) / 6.0 - 0.5


if __name__ == "__main__":
    key = jax.random.PRNGKey(0)

    # 1) Module-consistent small NCHW input (8 KiB) -> tiny-input XLA fast path.
    x = jax.random.normal(key, (2, 4, 16, 16), dtype=jnp.float32) * 2.0
    y = neg_hardsigmoid(x)
    jax.block_until_ready(y)
    assert y.shape == x.shape and y.dtype == x.dtype
    assert jnp.allclose(y, neg_hardsigmoid_ref(x), atol=1e-5, rtol=1e-5)

    # 2) Same input, Pallas path forced (single full-extent block).
    y_p = neg_hardsigmoid(x, xla_fastpath_bytes=0)
    jax.block_until_ready(y_p)
    assert jnp.allclose(y_p, neg_hardsigmoid_ref(x), atol=1e-5, rtol=1e-5)

    # 3) Pallas path with a multi-step grid and a masked partial last block
    #    (rows=15, tile=8 rows) via a small target_block_bytes override.
    x3 = jax.random.normal(jax.random.PRNGKey(1), (2, 5, 24, 128), dtype=jnp.float32)
    y3 = neg_hardsigmoid(x3, xla_fastpath_bytes=0, target_block_bytes=64 * 1024)
    jax.block_until_ready(y3)
    assert jnp.allclose(y3, neg_hardsigmoid_ref(x3), atol=1e-5, rtol=1e-5)

    # 4) bf16 end-to-end through the Pallas path (16-row sublane packing).
    x4 = jax.random.normal(jax.random.PRNGKey(2), (4, 16, 32, 48), dtype=jnp.bfloat16)
    y4 = neg_hardsigmoid(x4, xla_fastpath_bytes=0)
    jax.block_until_ready(y4)
    assert y4.dtype == jnp.bfloat16
    assert jnp.allclose(
        y4.astype(jnp.float32),
        neg_hardsigmoid_ref(x4.astype(jnp.float32)),
        atol=1e-2, rtol=1e-2,
    )

    # 5) Ragged odd-sized shape -> fused-XLA fallback path (no pad/slice round trips).
    x5 = jax.random.normal(jax.random.PRNGKey(3), (3, 7, 33, 17), dtype=jnp.float32)
    y5 = neg_hardsigmoid(x5)
    jax.block_until_ready(y5)
    assert jnp.allclose(y5, neg_hardsigmoid_ref(x5), atol=1e-5, rtol=1e-5)

    print("KERNEL_OK")
</pallas_src>

<mosaic_0001>
module attributes {stable_mosaic.version = 11 : i64} {
  func.func @_neg_hardsigmoid_kernel(%arg0: i32, %arg1: memref<1x2048xf32, #tpu.memory_space<vmem>>, %arg2: memref<1x2048xf32, #tpu.memory_space<vmem>>) attributes {dimension_semantics = [#tpu.dimension_semantics<parallel>], iteration_bounds = array<i64: 1>, scalar_prefetch = 0 : i64, scratch_operands = 0 : i64, tpu.core_type = #tpu.core_type<tc>, window_params = [{transform_indices = @transform_0, window_bounds = array<i64: 1, 2048>}, {transform_indices = @transform_1, window_bounds = array<i64: 1, 2048>}]} {
    %c0 = arith.constant 0 : index
    %c0_0 = arith.constant 0 : index
    %0 = vector.load %arg1[%c0, %c0_0] : memref<1x2048xf32, #tpu.memory_space<vmem>>, vector<1x2048xf32>
    %cst = arith.constant 5.000000e-01 : f32
    %1 = vector.broadcast %cst : f32 to vector<1x2048xf32>
    %2 = arith.mulf %0, %1 : vector<1x2048xf32>
    %cst_1 = arith.constant -5.000000e-01 : f32
    %cst_2 = arith.constant 5.000000e-01 : f32
    %3 = vector.broadcast %cst_1 : f32 to vector<1x2048xf32>
    %4 = arith.maximumf %3, %2 : vector<1x2048xf32>
    %5 = vector.broadcast %cst_2 : f32 to vector<1x2048xf32>
    %6 = arith.minimumf %5, %4 : vector<1x2048xf32>
    %c0_3 = arith.constant 0 : index
    %c0_4 = arith.constant 0 : index
    %7 = vector.load %arg2[%c0_3, %c0_4] : memref<1x2048xf32, #tpu.memory_space<vmem>>, vector<1x2048xf32>
    tpu.vector_store %arg2[%c0_3, %c0_4], %6 {strides = array<i32>} : memref<1x2048xf32, #tpu.memory_space<vmem>>, vector<1x2048xf32>,
    return
  }
  func.func @transform_0(%arg0: i32) -> (i32, i32) {
    %c0_i32 = arith.constant 0 : i32
    %c0_i32_0 = arith.constant 0 : i32
    return %arg0, %c0_i32 : i32, i32
  }
  func.func @transform_1(%arg0: i32) -> (i32, i32) {
    %c0_i32 = arith.constant 0 : i32
    %c0_i32_0 = arith.constant 0 : i32
    return %arg0, %c0_i32 : i32, i32
  }
}

</mosaic_0001>

<bundles_post_ra>
// kernel: tpu_custom_call.1
= control target key start
LH: loop header
LB: loop body
LE: loop exit
PB: predicated region body
PF: predicated region fallthrough
CT: control target
= control target key end

     0   :  { %6 = vsyncpa [#allocation3], 0  ;;  %s134_s0 = inlined_call_operand.hbm [shape: f32[1,2048], index: 0, kind: input, shape index: {}]   ;;  %s135_s1 = inlined_call_operand.hbm [shape: f32[1,2048], index: 1, kind: output, shape index: {}]  }
   0x1   :  { %7 = vsyncpa [#allocation4], 0  ;;  %s98_s6 = smov [#allocation2]   ;;  %s50_s10 = scalar_lea.hbm %s134_s0, 256 }
   0x2   :  { %s14_s7 = sshll.u32 %s98_s6, 4  ;;  %p51_p0 = scmp.ne.s32.totalorder %s134_s0, %s50_s10  ;;  %s15_s7 = int_to_ptr.vmem [resolvable:$true] %s14_s7 }
   0x3   :  { %p54_p1 = scmp.lt.u32.totalorder %s50_s10, %s134_s0 }
   0x5   :  { %p56_p2 = pnand %p54_p1, %p51_p0 }
   0x7   :  { %59 = shalt.err (!%p56_p2)
}
   0x8   :  { %s60_s15 = scalar_lea.vmem %s15_s7, 256  ;;  %p65_p4 = scmp.lt.s32.totalorder %s15_s7, %s15_s7 }
   0x9   :  { %p61_p3 = scmp.ne.s32.totalorder %s15_s7, %s60_s15  ;;  %p66_p5 = scmp.lt.s32.totalorder %s60_s15, %s60_s15 }
   0xb   :  { %p67_p6 = por %p66_p5, %p65_p4 }
   0xd   :  { %p68_p7 = pnand %p67_p6, %p61_p3 }
   0xf   :  { %71 = shalt.err (!%p68_p7)
}
  0x10   :  { %17 = dma.hbm_to_vmem [thread:$0]  %s134_s0, 256, %s15_s7, [#allocation3]  }
  0x11   :  { %94 = dma.done.wait [#allocation3], 256  }
  0x12   :  { %95 = vsyncadd [#allocation3], 4294967040  ;;  %v21_v0 = vld [vmem:[#allocation2] sm:$0xff]  ;;  %v22_v1 = vld [vmem:[#allocation2 + $0x8] sm:$0xff]  ;;  %s99_s18 = smov [#allocation5]  }
  0x13   :  { %s37_s19 = sshll.u32 %s99_s18, 4  ;;  %v23_v2 = vmul.f32 0.5, %v21_v0  ;;  %v24_v3 = vmul.f32 0.5, %v22_v1  ;;  %s38_s19 = int_to_ptr.vmem [resolvable:$true] %s37_s19 }
  0x14   :  { %s72_s20 = scalar_lea.vmem %s38_s19, 256  ;;  %p77_p9 = scmp.lt.s32.totalorder %s38_s19, %s38_s19 }
  0x15   :  { %v46_v4 = vclamps-f32 %v23_v2, 0.5  ;;  %v47_v5 = vclamps-f32 %v24_v3, 0.5  ;;  %p73_p8 = scmp.ne.s32.totalorder %s38_s19, %s72_s20  ;;  %p78_p10 = scmp.lt.s32.totalorder %s72_s20, %s72_s20 }
  0x17   :  { %29 = vst [vmem:[#allocation5] sm:$0xff] %v46_v4  ;;  %30 = vst [vmem:[#allocation5 + $0x8] sm:$0xff] %v47_v5  ;;  %p79_p11 = por %p78_p10, %p77_p9 }
  0x19   :  { %p80_p12 = pnand %p79_p11, %p73_p8 }
  0x1b   :  { %83 = shalt.err (!%p80_p12)
}
  0x1c   :  { %s84_s22 = scalar_lea.hbm %s135_s1, 256 }
  0x1d   :  { %p85_p13 = scmp.ne.s32.totalorder %s135_s1, %s84_s22  ;;  %p88_p0 = scmp.lt.u32.totalorder %s84_s22, %s135_s1 }
  0x1f   :  { %p90_p1 = pnand %p88_p0, %p85_p13 }
  0x21   :  { %93 = shalt.err (!%p90_p1)
}
  0x22   :  { %40 = dma.vmem_to_hbm [thread:$0]  %s38_s19, 256, %s135_s1, [#allocation4]  }
  0x23   :  { %96 = dma.done.wait [#allocation4], 256  }
  0x24   :  { %97 = vsyncadd [#allocation4], 4294967040 }
  0x25   :  { %44 = vsyncpa [#allocation3], 1 }
  0x26   :  { %45 = vsyncpa [#allocation4], 1 }

</bundles_post_ra>
